<compile_context>
chip_gen: v6e
topology: v6e:2x2x1
jax: 0.10.0
libtpu: 0.0.40
codegen_flags: <defaults>
</compile_context>

<pallas_src>
import jax
import jax.numpy as jnp
from jax.experimental import pallas as pl
from jax.experimental.pallas import tpu as pltpu


def _cat_tanh_kernel(x_ref, o_ref):
    # x_ref: (B, F) VMEM block, o_ref: (B, 2*F) VMEM block.
    f = x_ref.shape[1]  # static Python int
    # tanh goes to the EUP; input/output are f32 here so the astype is a
    # no-op (kept so a future bf16 output path stores narrow on v6e/v7x).
    t = jnp.tanh(x_ref[...]).astype(o_ref.dtype)
    # Two static slice stores instead of jnp.concatenate([t, t], axis=-1):
    # keeps live vreg pressure at F (not 2F) and avoids XLU shuffles / an
    # extra VMEM materialization when F is large. Neutral at this tiny size.
    o_ref[:, :f] = t
    o_ref[:, f:] = t


def model_forward(x):
    """x: (B, C, H). Returns tanh(cat((x, x), dim=1).view(B, -1))."""
    b = x.shape[0]
    x_flat = x.reshape(b, -1)  # (B, F)
    f = x_flat.shape[1]
    n_elem = b * f
    itemsize = jnp.dtype(x.dtype).itemsize
    # Advisory cost estimate: 0 flops, B*F tanh's, read B*F + write 2*B*F.
    # Lets XLA's scheduler overlap this overhead-dominated custom call with
    # neighboring ops.
    cost = pl.CostEstimate(
        flops=0,
        transcendentals=n_elem,
        bytes_accessed=3 * n_elem * itemsize,
    )
    # At this problem size (3x8 f32 output) the whole array is a single VMEM
    # block: no grid, no scalar prefetch, one DMA in / one DMA out. The call
    # is launch-overhead bound on every TPU generation, so any in-kernel
    # micro-optimization is moot; the kernel body is kept scale-ready instead.
    out = pl.pallas_call(
        _cat_tanh_kernel,
        out_shape=jax.ShapeDtypeStruct((b, 2 * f), x.dtype),
        in_specs=[pl.BlockSpec(memory_space=pltpu.MemorySpace.VMEM)],
        out_specs=pl.BlockSpec(memory_space=pltpu.MemorySpace.VMEM),
        cost_estimate=cost,
    )(x_flat)
    return out
    # TODO(synk): if B*F grows, tile over B with a grid:
    #   - lane-dense output: pad/choose F so 2F is a multiple of 128
    #     (unmasked vst instead of vst.msk partial stores — biggest lever),
    #   - B-tile a multiple of 8 (16 for bf16), block >= 512 rows to amortize
    #     the ~0.35 us/grid-step overhead,
    #   - dimension_semantics=("parallel",) so v7x shards across both TCs,
    #   - re-derive tile size for v7x: ~24*tm*F bytes double-buffered must fit
    #     in 64 MiB physical / 32 MiB scoped VMEM (set vmem_limit_bytes if
    #     raised); don't reuse a v6e/v5e 128 MiB-sized tile.


if __name__ == "__main__":
    key = jax.random.PRNGKey(0)
    x = jax.random.normal(key, (3, 2, 2), dtype=jnp.float32)

    out = model_forward(x)
    jax.block_until_ready(out)

    # Reference in plain JAX (matches torch.cat((x, x), 1).view(B, -1).tanh()).
    ref = jnp.tanh(jnp.concatenate([x, x], axis=1).reshape(x.shape[0], -1))
    assert out.shape == (3, 8), out.shape
    assert jnp.allclose(out, ref, atol=1e-6), "mismatch vs reference"
    print("KERNEL_OK")
</pallas_src>

<mosaic_0001>
module attributes {stable_mosaic.version = 11 : i64} {
  func.func @_cat_tanh_kernel(%arg0: memref<3x4xf32, #tpu.memory_space<vmem>>, %arg1: memref<3x8xf32, #tpu.memory_space<vmem>>) attributes {dimension_semantics = [], scalar_prefetch = 0 : i64, scratch_operands = 0 : i64, tpu.core_type = #tpu.core_type<tc>} {
    %c0 = arith.constant 0 : index
    %c0_0 = arith.constant 0 : index
    %0 = vector.load %arg0[%c0, %c0_0] : memref<3x4xf32, #tpu.memory_space<vmem>>, vector<3x4xf32>
    %1 = math.tanh %0 : vector<3x4xf32>
    %c0_1 = arith.constant 0 : index
    %c0_2 = arith.constant 0 : index
    %2 = vector.load %arg1[%c0_1, %c0_2] : memref<3x8xf32, #tpu.memory_space<vmem>>, vector<3x4xf32>
    tpu.vector_store %arg1[%c0_1, %c0_2], %1 {strides = array<i32>} : memref<3x8xf32, #tpu.memory_space<vmem>>, vector<3x4xf32>,
    %c0_3 = arith.constant 0 : index
    %c4 = arith.constant 4 : index
    %3 = vector.load %arg1[%c0_3, %c4] : memref<3x8xf32, #tpu.memory_space<vmem>>, vector<3x4xf32>
    tpu.vector_store %arg1[%c0_3, %c4], %1 {strides = array<i32>} : memref<3x8xf32, #tpu.memory_space<vmem>>, vector<3x4xf32>,
    return
  }
}

</mosaic_0001>

<bundles_post_ra>
// kernel: tpu_custom_call.1
= control target key start
LH: loop header
LB: loop body
LE: loop exit
PB: predicated region body
PF: predicated region fallthrough
CT: control target
= control target key end

     0   :  { %6 = vsyncpa [#allocation3], 0  ;;  %s114_s0 = inlined_call_operand.hbm [shape: f32[3,4], index: 0, kind: input, shape index: {}]   ;;  %s115_s1 = inlined_call_operand.hbm [shape: f32[3,8], index: 1, kind: output, shape index: {}]  }
   0x1   :  { %7 = vsyncpa [#allocation4], 0  ;;  %s95_s6 = smov [#allocation2]  }
   0x2   :  { %s14_s7 = sshll.u32 %s95_s6, 4  ;;  %s15_s7 = int_to_ptr.vmem [resolvable:$true] %s14_s7 }
   0x3   :  { %s59_s8 = scalar_lea.vmem %s15_s7, 64  ;;  %p64_p1 = scmp.lt.s32.totalorder %s15_s7, %s15_s7 }
   0x4   :  { %p60_p0 = scmp.ne.s32.totalorder %s15_s7, %s59_s8  ;;  %p65_p2 = scmp.lt.s32.totalorder %s59_s8, %s59_s8 }
   0x6   :  { %p66_p3 = por %p65_p2, %p64_p1 }
   0x8   :  { %p67_p4 = pnand %p66_p3, %p60_p0 }
   0xa   :  { %70 = shalt.err (!%p67_p4)
}
   0xb   :  { %17 = dma.hbm_to_vmem [thread:$0]  %s114_s0, 64, %s15_s7, [#allocation3]  }
   0xc   :  { %91 = dma.done.wait [#allocation3], 64  }
   0xd   :  { %92 = vsyncadd [#allocation3], 4294967232  ;;  %v21_v0 = vld [vmem:[#allocation2] sm:$0x7]  ;;  %vm23_vm0 = vcmask 26624   ;;  %s96_s11 = smov 4  }
   0xe   :  { %49 = vtanh.f32 %v21_v0  ;;  %s97_s12 = smov [#allocation5]   ;;  %vm29_vm1 = vcmask 59424  }
   0xf   :  { %s37_s13 = sshll.u32 %s97_s12, 4  ;;  %s38_s13 = int_to_ptr.vmem [resolvable:$true] %s37_s13 }
  0x10   :  { %s71_s14 = scalar_lea.vmem %s38_s13, 64  ;;  %p76_p6 = scmp.lt.s32.totalorder %s38_s13, %s38_s13 }
  0x11   :  { %p72_p5 = scmp.ne.s32.totalorder %s38_s13, %s71_s14  ;;  %p77_p7 = scmp.lt.s32.totalorder %s71_s14, %s71_s14 }
  0x13   :  { %p78_p8 = por %p77_p7, %p76_p6 }
  0x15   :  { %p79_p9 = pnand %p78_p8, %p72_p5 }
  0x1b   :  { %v50_v1 = vpop.eup %49 }
  0x1c   :  { %24 = vst.msk [vmem:[#allocation5] sm:$0x7] %vm23_vm0, %v50_v1  ;;  %26 = vrot.lane.b32.xlu0 %v50_v1, %s96_s11 }
  0x8e   :  { %v27_v2 = vpop.permute.xlu0 %26 }
  0x8f   :  { %30 = vst.msk [vmem:[#allocation5] sm:$0x7] %vm29_vm1, %v27_v2 }
  0x90   :  { %82 = shalt.err (!%p79_p9)
}
  0x91   :  { %40 = dma.vmem_to_hbm [thread:$0]  %s38_s13, 64, %s115_s1, [#allocation4]  }
  0x92   :  { %93 = dma.done.wait [#allocation4], 64  }
  0x93   :  { %94 = vsyncadd [#allocation4], 4294967232 }
  0x94   :  { %44 = vsyncpa [#allocation3], 1 }
  0x95   :  { %45 = vsyncpa [#allocation4], 1 }

</bundles_post_ra>
